<compile_context>
chip_gen: v7x
topology: tpu7x:2x2x1
jax: 0.10.0
libtpu: 0.0.40
codegen_flags: <defaults>
</compile_context>

<pallas_src>
import functools

import jax
import jax.numpy as jnp
from jax.experimental import pallas as pl
from jax.experimental.pallas import tpu as pltpu


# ----------------------------------------------------------------------------- kernels
def _fused_linear_kernel(x_ref, w_ref, b_ref, o_ref):
    # (TB, D) @ (D, TC) + (1, TC), fp32 accumulation on the MXU.
    y = jnp.dot(x_ref[...], w_ref[...], preferred_element_type=jnp.float32)
    o_ref[...] = (y + b_ref[...]).astype(o_ref.dtype)


def _mlp2_kernel(x_ref, w0_ref, b0_ref, w1_ref, b1_ref, o_ref, h_ref):
    # Grid is (batch_tiles, class_tiles); the class axis is innermost ("arbitrary"),
    # so the first-layer activation is computed once per batch tile and cached in
    # fp32 VMEM scratch, then reused for every class tile.
    @pl.when(pl.program_id(1) == 0)
    def _():
        h = jnp.dot(x_ref[...], w0_ref[...], preferred_element_type=jnp.float32)
        h_ref[...] = h + b0_ref[...]
    y = jnp.dot(h_ref[...].astype(w1_ref.dtype), w1_ref[...],
                preferred_element_type=jnp.float32)
    o_ref[...] = (y + b1_ref[...]).astype(o_ref.dtype)


# ----------------------------------------------------------------------------- helpers
def _round_up(n, m):
    return ((n + m - 1) // m) * m


def _physical_vmem_bytes():
    """Physical VMEM of this generation; conservative 64 MiB (v7x per-TC) fallback."""
    try:
        info = pltpu.get_tpu_info()
        phys = int(getattr(info, "vmem_capacity_bytes", 0) or 0)
        if phys > 0:
            return phys
    except Exception:
        pass
    return 64 * 1024 * 1024


# ----------------------------------------------------------------------------- parameter prep (hoist out of the hot path)
def prepare_params(w0, b0, w1, b1, *,
                   compute_dtype=jnp.bfloat16,
                   fuse_layers=None,
                   class_tile=None):
    """Prepares (fused or per-layer) weights once: cast to compute dtype, lane-pad
    the class dimension to a multiple of 128, fold biases for the fused path.

    w0: (D, H)  w1: (H, C)  (transpose of nn.Linear.weight);  b0: (H,)  b1: (C,).
    Returns (params, cfg) for apply_prepared()."""
    D, H = w0.shape
    H2, C = w1.shape
    assert H2 == H, "w0/w1 inner dims must match"
    cdt = jnp.dtype(compute_dtype)
    itemsize = cdt.itemsize
    C_pad = _round_up(C, 128)  # lane-dense output slab -> unmasked stores

    # Cost-based fusion: fold only when it does not inflate FLOPs / weight bytes.
    if fuse_layers is None:
        fuse_layers = (D * C_pad) <= (D * H + H * C_pad)

    phys = _physical_vmem_bytes()
    budget = int(phys * 0.7)  # leave headroom for the compiler / pipeline bookkeeping

    def _w_bytes(tc):
        if fuse_layers:
            return D * tc * itemsize + 4 * tc
        return (D * H + H * tc) * itemsize + 4 * (H + tc)

    if class_tile is None:
        # Largest class tile (divisor of C_pad, multiple of 128) whose
        # double-buffered resident weights stay under half of the budget,
        # leaving the rest for large batch tiles.
        tc = 128
        for t in range(128, C_pad + 1, 128):
            if C_pad % t == 0 and 2 * _w_bytes(t) <= budget // 2:
                tc = t
    else:
        tc = int(class_tile)
        assert tc % 128 == 0 and C_pad % tc == 0, \
            "class_tile must be a multiple of 128 dividing the padded class dim"

    if fuse_layers:
        # Fold the two affine layers in fp32; cast the fused weight to compute dtype.
        w_f = w0.astype(jnp.float32) @ w1.astype(jnp.float32)                      # (D, C)
        b_f = b0.astype(jnp.float32) @ w1.astype(jnp.float32) + b1.astype(jnp.float32)
        w_pad = jnp.zeros((D, C_pad), cdt).at[:, :C].set(w_f.astype(cdt))
        b_pad = jnp.zeros((1, C_pad), jnp.float32).at[0, :C].set(b_f)
        params = (w_pad, b_pad)
    else:
        w0c = w0.astype(cdt)
        b0r = b0.astype(jnp.float32).reshape(1, H)
        w1_pad = jnp.zeros((H, C_pad), cdt).at[:, :C].set(w1.astype(cdt))
        b1_pad = jnp.zeros((1, C_pad), jnp.float32).at[0, :C].set(b1.astype(jnp.float32))
        params = (w0c, b0r, w1_pad, b1_pad)

    cfg = dict(D=D, H=H, C=C, C_pad=C_pad, class_tile=tc, fused=bool(fuse_layers),
               cdt=cdt, budget=budget, phys=phys)
    return params, cfg


# ----------------------------------------------------------------------------- forward
def apply_prepared(x, params, *, cfg, batch_tile=None, out_dtype=None,
                   interpret=False):
    """x: (B, D).  Returns (B, C) in out_dtype (default: x.dtype)."""
    B, D = x.shape
    assert D == cfg["D"], "input feature dim mismatch"
    cdt = cfg["cdt"]
    H, C, C_pad, tc = cfg["H"], cfg["C"], cfg["C_pad"], cfg["class_tile"]
    fused, budget, phys = cfg["fused"], cfg["budget"], cfg["phys"]
    out_dtype = jnp.dtype(out_dtype) if out_dtype is not None else x.dtype
    itemsize = cdt.itemsize
    out_itemsize = out_dtype.itemsize

    # Resident (weight/bias) footprint; the pipeliner double-buffers each input.
    if fused:
        w_bytes = D * tc * itemsize + 4 * tc
    else:
        w_bytes = (D * H + H * tc) * itemsize + 4 * (H + tc)
    resident = 2 * w_bytes
    scratch_per_row = 0 if fused else 4 * H  # fp32 activation scratch (single copy)

    # Batch tile: biggest multiple of 8 whose double-buffered x/out tiles (+ scratch)
    # fit the remaining budget. Pad B with zero rows instead of shrinking the tile.
    if batch_tile is None:
        per_row = 2 * (D * itemsize + tc * out_itemsize) + scratch_per_row
        fit = max(8, (max(budget - resident, 0) // max(per_row, 1)) // 8 * 8)
        tb = min(fit, _round_up(B, 8))
    else:
        tb = int(batch_tile)
        assert tb % 8 == 0, "batch_tile must be a multiple of 8"
    B_pad = _round_up(B, tb)
    nb, nc = B_pad // tb, C_pad // tc

    footprint = resident + tb * (2 * (D * itemsize + tc * out_itemsize) + scratch_per_row)
    vmem_limit = int(min(max(footprint * 5 // 4 + (8 << 20), 32 << 20),
                         int(phys * 0.9)))

    xk = x.astype(cdt)
    if B_pad != B:
        xk = jnp.pad(xk, ((0, B_pad - B), (0, 0)))

    x_spec = pl.BlockSpec((tb, D), lambda i, j: (i, 0))
    out_spec = pl.BlockSpec((tb, tc), lambda i, j: (i, j))
    out_shape = jax.ShapeDtypeStruct((B_pad, C_pad), out_dtype)

    if fused:
        w_pad, b_pad = params
        flops = 2 * B_pad * D * C_pad
        bytes_accessed = ((B_pad * D + D * C_pad) * itemsize + 4 * C_pad
                          + B_pad * C_pad * out_itemsize)
        out_pad = pl.pallas_call(
            _fused_linear_kernel,
            out_shape=out_shape,
            grid_spec=pltpu.PrefetchScalarGridSpec(
                num_scalar_prefetch=0,
                grid=(nb, nc),
                in_specs=[
                    x_spec,                                       # x tile (pipelined)
                    pl.BlockSpec((D, tc), lambda i, j: (0, j)),   # fused W tile (resident per class tile)
                    pl.BlockSpec((1, tc), lambda i, j: (0, j)),   # fused bias (fp32)
                ],
                out_specs=out_spec,
            ),
            compiler_params=pltpu.CompilerParams(
                dimension_semantics=("parallel", "parallel"),
                vmem_limit_bytes=vmem_limit,
            ),
            cost_estimate=pl.CostEstimate(flops=int(flops), transcendentals=0,
                                          bytes_accessed=int(bytes_accessed)),
            interpret=interpret,
        )(xk, w_pad, b_pad)
    else:
        w0c, b0r, w1_pad, b1_pad = params
        flops = 2 * B_pad * (D * H + H * C_pad)
        bytes_accessed = ((B_pad * D + D * H + H * C_pad) * itemsize
                          + 4 * (H + C_pad) + B_pad * C_pad * out_itemsize)
        out_pad = pl.pallas_call(
            _mlp2_kernel,
            out_shape=out_shape,
            grid_spec=pltpu.PrefetchScalarGridSpec(
                num_scalar_prefetch=0,
                grid=(nb, nc),
                in_specs=[
                    x_spec,                                        # x tile (pipelined)
                    pl.BlockSpec((D, H), lambda i, j: (0, 0)),     # W0 (resident)
                    pl.BlockSpec((1, H), lambda i, j: (0, 0)),     # b0 (fp32)
                    pl.BlockSpec((H, tc), lambda i, j: (0, j)),    # W1 class tile
                    pl.BlockSpec((1, tc), lambda i, j: (0, j)),    # b1 (fp32)
                ],
                out_specs=out_spec,
                scratch_shapes=[pltpu.VMEM((tb, H), jnp.float32)],  # cached activation
            ),
            compiler_params=pltpu.CompilerParams(
                # Class axis carries the activation scratch -> keep it sequential.
                dimension_semantics=("parallel", "arbitrary"),
                vmem_limit_bytes=vmem_limit,
            ),
            cost_estimate=pl.CostEstimate(flops=int(flops), transcendentals=0,
                                          bytes_accessed=int(bytes_accessed)),
            interpret=interpret,
        )(xk, w0c, b0r, w1_pad, b1_pad)

    return out_pad[:B, :C]


def feat_classifier_two_forward(x, w0, b0, w1, b1, *,
                                compute_dtype=jnp.bfloat16,
                                fuse_layers=None,
                                class_tile=None,
                                batch_tile=None,
                                out_dtype=None,
                                interpret=False):
    """Convenience one-shot wrapper. For repeated calls, hoist prepare_params()
    out of the hot path and jit apply_prepared() instead."""
    params, cfg = prepare_params(w0, b0, w1, b1, compute_dtype=compute_dtype,
                                 fuse_layers=fuse_layers, class_tile=class_tile)
    return apply_prepared(x, params, cfg=cfg, batch_tile=batch_tile,
                          out_dtype=out_dtype, interpret=interpret)


def init_params(key, input_dim, bottleneck_dim, class_num, dtype=jnp.float32):
    """Deterministic init mirroring nn.Linear shapes. PyTorch stores weight as
    (out, in); we store the transpose (in, out)."""
    k0, k1, k2, k3 = jax.random.split(key, 4)
    lim0 = 1.0 / (input_dim ** 0.5)
    lim1 = 1.0 / (bottleneck_dim ** 0.5)
    w0 = jax.random.uniform(k0, (input_dim, bottleneck_dim), dtype, -lim0, lim0)
    b0 = jax.random.uniform(k1, (bottleneck_dim,), dtype, -lim0, lim0)
    w1 = jax.random.uniform(k2, (bottleneck_dim, class_num), dtype, -lim1, lim1)
    b1 = jax.random.uniform(k3, (class_num,), dtype, -lim1, lim1)
    return w0, b0, w1, b1


if __name__ == "__main__":
    # Small shapes consistent with the module: input_dim=32, bottleneck=256, class_num=16.
    D, H, C = 32, 256, 16
    key = jax.random.PRNGKey(0)
    kx, kp, kq = jax.random.split(key, 3)
    w0, b0, w1, b1 = init_params(kp, D, H, C)

    def ref(x, w0, b0, w1, b1):
        x32 = x.astype(jnp.float32)
        return (x32 @ w0.astype(jnp.float32) + b0) @ w1.astype(jnp.float32) + b1

    # 1) fp32 compute, prepared params hoisted, jitted apply (auto -> fused path).
    x1 = jax.random.normal(kx, (8, D), jnp.float32)
    params, cfg = prepare_params(w0, b0, w1, b1, compute_dtype=jnp.float32)
    fwd = jax.jit(functools.partial(apply_prepared, cfg=cfg))
    out1 = jax.block_until_ready(fwd(x1, params))
    assert out1.shape == (8, C)
    assert jnp.allclose(out1, ref(x1, w0, b0, w1, b1), atol=1e-4, rtol=1e-4), \
        "fused fp32 kernel mismatch vs reference"

    # 2) default bf16 compute (fp32 accumulate / fp32 bias), B not a multiple of 8
    #    (exercises zero-row padding + slice inside the call).
    x2 = jax.random.normal(kq, (20, D), jnp.float32)
    ref2 = ref(x2, w0, b0, w1, b1)
    out2 = jax.block_until_ready(feat_classifier_two_forward(x2, w0, b0, w1, b1))
    assert out2.shape == (20, C)
    assert jnp.allclose(out2, ref2, atol=5e-2, rtol=5e-2), "bf16 fused kernel mismatch"

    # 3) unfused two-matmul path, fp32, bit-tight vs the PyTorch graph.
    out3 = jax.block_until_ready(
        feat_classifier_two_forward(x2, w0, b0, w1, b1,
                                    compute_dtype=jnp.float32, fuse_layers=False))
    assert jnp.allclose(out3, ref2, atol=1e-4, rtol=1e-4), "two-layer kernel mismatch"

    # 4) class-dimension grid axis (C=200 -> C_pad=256, class_tile=128) plus a forced
    #    multi-step batch grid, on both the fused and unfused kernels.
    C2 = 200
    w0b, b0b, w1b, b1b = init_params(jax.random.PRNGKey(1), D, H, C2)
    x4 = jax.random.normal(jax.random.PRNGKey(2), (24, D), jnp.float32)
    ref4 = ref(x4, w0b, b0b, w1b, b1b)
    out4f = jax.block_until_ready(
        feat_classifier_two_forward(x4, w0b, b0b, w1b, b1b,
                                    compute_dtype=jnp.float32, fuse_layers=True,
                                    class_tile=128, batch_tile=8))
    assert out4f.shape == (24, C2)
    assert jnp.allclose(out4f, ref4, atol=1e-4, rtol=1e-4), "class-tiled fused mismatch"
    out4u = jax.block_until_ready(
        feat_classifier_two_forward(x4, w0b, b0b, w1b, b1b,
                                    compute_dtype=jnp.float32, fuse_layers=False,
                                    class_tile=128, batch_tile=8))
    assert jnp.allclose(out4u, ref4, atol=1e-4, rtol=1e-4), "class-tiled unfused mismatch"

    print("KERNEL_OK")
</pallas_src>

<mosaic_0001>
module attributes {stable_mosaic.version = 11 : i64} {
  func.func @_fused_linear_kernel(%arg0: i32, %arg1: i32, %arg2: memref<8x32xf32, #tpu.memory_space<vmem>>, %arg3: memref<32x128xf32, #tpu.memory_space<vmem>>, %arg4: memref<1x128xf32, #tpu.memory_space<vmem>>, %arg5: memref<8x128xf32, #tpu.memory_space<vmem>>) attributes {dimension_semantics = [#tpu.dimension_semantics<parallel>, #tpu.dimension_semantics<parallel>], iteration_bounds = array<i64: 1, 1>, scalar_prefetch = 0 : i64, scratch_operands = 0 : i64, tpu.core_type = #tpu.core_type<tc>, window_params = [{transform_indices = @transform_0, window_bounds = array<i64: 8, 32>}, {transform_indices = @transform_1, window_bounds = array<i64: 32, 128>}, {transform_indices = @transform_2, window_bounds = array<i64: 1, 128>}, {transform_indices = @transform_3, window_bounds = array<i64: 8, 128>}]} {
    %c0 = arith.constant 0 : index
    %c0_0 = arith.constant 0 : index
    %0 = vector.load %arg2[%c0, %c0_0] : memref<8x32xf32, #tpu.memory_space<vmem>>, vector<8x32xf32>
    %c0_1 = arith.constant 0 : index
    %c0_2 = arith.constant 0 : index
    %1 = vector.load %arg3[%c0_1, %c0_2] : memref<32x128xf32, #tpu.memory_space<vmem>>, vector<32x128xf32>
    %cst = arith.constant dense<0.000000e+00> : vector<8x128xf32>
    %2 = tpu.matmul %0, %1, %cst {dimension_numbers = #tpu.dot_dimension_numbers<[1], [0], [0], [1], [0, 0, 1, 1], [], []>} : vector<8x32xf32>, vector<32x128xf32>, vector<8x128xf32> -> vector<8x128xf32>
    %c0_3 = arith.constant 0 : index
    %c0_4 = arith.constant 0 : index
    %3 = vector.load %arg4[%c0_3, %c0_4] : memref<1x128xf32, #tpu.memory_space<vmem>>, vector<1x128xf32>
    %4 = vector.broadcast %3 : vector<1x128xf32> to vector<8x128xf32>
    %5 = arith.addf %2, %4 : vector<8x128xf32>
    %c0_5 = arith.constant 0 : index
    %c0_6 = arith.constant 0 : index
    %6 = vector.load %arg5[%c0_5, %c0_6] : memref<8x128xf32, #tpu.memory_space<vmem>>, vector<8x128xf32>
    tpu.vector_store %arg5[%c0_5, %c0_6], %5 {strides = array<i32>} : memref<8x128xf32, #tpu.memory_space<vmem>>, vector<8x128xf32>,
    return
  }
  func.func @transform_0(%arg0: i32, %arg1: i32) -> (i32, i32) {
    %c0_i32 = arith.constant 0 : i32
    %c0_i32_0 = arith.constant 0 : i32
    return %arg0, %c0_i32 : i32, i32
  }
  func.func @transform_1(%arg0: i32, %arg1: i32) -> (i32, i32) {
    %c0_i32 = arith.constant 0 : i32
    %c0_i32_0 = arith.constant 0 : i32
    return %c0_i32, %arg1 : i32, i32
  }
  func.func @transform_2(%arg0: i32, %arg1: i32) -> (i32, i32) {
    %c0_i32 = arith.constant 0 : i32
    %c0_i32_0 = arith.constant 0 : i32
    return %c0_i32, %arg1 : i32, i32
  }
  func.func @transform_3(%arg0: i32, %arg1: i32) -> (i32, i32) {
    %c0_i32 = arith.constant 0 : i32
    return %arg0, %arg1 : i32, i32
  }
}

</mosaic_0001>

<bundles_post_ra>
// kernel: apply_prepared.1
= control target key start
LH: loop header
LB: loop body
LE: loop exit
PB: predicated region body
PF: predicated region fallthrough
CT: control target
= control target key end

     0   :  { %8 = vsyncpa [#allocation3], 0  ;;  %s322_s0 = inlined_call_operand.hbm [shape: f32[8,32], index: 0, kind: input, shape index: {}]   ;;  %s323_s1 = inlined_call_operand.hbm [shape: f32[32,128], index: 1, kind: input, shape index: {}]   ;;  %s324_s2 = inlined_call_operand.vmem [shape: f32[1,128], index: 2, kind: input, shape index: {}]   ;;  %s325_s3 = inlined_call_operand.hbm [shape: f32[8,128], index: 3, kind: output, shape index: {}]  }
   0x1   :  { %9 = vsyncpa [#allocation6], 0 }
   0x2   :  { %10 = vsyncpa [#allocation4], 0  ;;  %s248_s12 = smov [#allocation2]   ;;  %s249_s14 = smov [#allocation5]  }
   0x3   :  { %s17_s13 = sshll.u32 %s248_s12, 4  ;;  %s26_s15 = sshll.u32 %s249_s14, 4  ;;  %s18_s13 = int_to_ptr.vmem [resolvable:$true] %s17_s13  ;;  %s276_s15 = int_to_ptr.vmem [resolvable:$true] %s26_s15 }
   0x4   :  { %s176_s18 = scalar_lea.hbm %s322_s0, 128 }
   0x5   :  { %p177_p0 = scmp.ne.s32.totalorder %s322_s0, %s176_s18  ;;  %p180_p1 = scmp.lt.u32.totalorder %s176_s18, %s322_s0 }
   0x7   :  { %p182_p2 = pnand %p180_p1, %p177_p0 }
   0x9   :  { %185 = shalt.err (!%p182_p2)
}
   0xa   :  { %s186_s23 = scalar_lea.vmem %s18_s13, 128  ;;  %p191_p4 = scmp.lt.s32.totalorder %s18_s13, %s18_s13 }
   0xb   :  { %p187_p3 = scmp.ne.s32.totalorder %s18_s13, %s186_s23  ;;  %p192_p5 = scmp.lt.s32.totalorder %s186_s23, %s186_s23 }
   0xd   :  { %p193_p6 = por %p192_p5, %p191_p4 }
   0xf   :  { %p194_p7 = pnand %p193_p6, %p187_p3 }
  0x11   :  { %197 = shalt.err (!%p194_p7)
}
  0x12   :  { %20 = dma.hbm_to_vmem [thread:$0]  %s322_s0, 128, %s18_s13, [#allocation3]  }
  0x13   :  { %s198_s28 = scalar_lea.hbm %s323_s1, 512 }
  0x14   :  { %p199_p8 = scmp.ne.s32.totalorder %s323_s1, %s198_s28  ;;  %p202_p9 = scmp.lt.u32.totalorder %s198_s28, %s323_s1 }
  0x16   :  { %p204_p10 = pnand %p202_p9, %p199_p8 }
  0x18   :  { %207 = shalt.err (!%p204_p10)
}
  0x19   :  { %s208_s6 = scalar_lea.vmem %s276_s15, 512  ;;  %p213_p12 = scmp.lt.s32.totalorder %s276_s15, %s276_s15 }
  0x1a   :  { %p209_p11 = scmp.ne.s32.totalorder %s276_s15, %s208_s6  ;;  %p214_p13 = scmp.lt.s32.totalorder %s208_s6, %s208_s6 }
  0x1c   :  { %p215_p0 = por %p214_p13, %p213_p12 }
  0x1e   :  { %p216_p1 = pnand %p215_p0, %p209_p11 }
  0x20   :  { %219 = shalt.err (!%p216_p1)
}
  0x21   :  { %s250_s0 = smov 128   ;;  %s251_s7 = smov 8  }
  0x22   :  { %32 = dma.hbm_to_vmem [thread:$0]  %s323_s1, 512, %s276_s15, [#allocation6], %s250_s0, %s250_s0, %s251_s7  }
  0x23   :  { %242 = dma.done.wait [#allocation3], 128  }
  0x24   :  { %243 = vsyncadd [#allocation3], 4294967168 }
  0x25   :  { %244 = dma.done.wait [#allocation6], 512  }
  0x26   :  { %245 = vsyncadd [#allocation6], 4294966784  ;;  %v252_v0 = vmov 0.0|0.0   ;;  %vm253_vm0 = vmmov 0   ;;  %v254_v1 = vmov 0.0   ;;  %v42_v2 = vld [vmem:[#allocation5] sm:$0xff] }
  0x27   :  { %162 = vmatprep.subr.bf16.mxu0 %v252_v0  ;;  %159 = vmatprep.mubr.msk.f32.mxu0 %vm253_vm0, %v254_v1  ;;  %v43_v3 = vld [vmem:[#allocation5 + $0x8] sm:$0xff]  ;;  %v44_v4 = vld [vmem:[#allocation5 + $0x10] sm:$0xff]  ;;  %v45_v6 = vld [vmem:[#allocation5 + $0x18] sm:$0xff]  ;;  %vm53_vm1 = vcmask 261120   ;;  %s255_s11 = smov [#allocation7]  }
  0x28   :  { %v163_v5 = vpack.c.bf16 %v43_v3, %v42_v2  ;;  %v166_v7 = vpack.c.bf16 %v45_v6, %v44_v4  ;;  %v41_v8 = vld [vmem:[#allocation2] sm:$0xff]  ;;  %s134_s12 = sshll.u32 %s255_s11, 4  ;;  %s135_s12 = int_to_ptr.vmem [resolvable:$true] %s134_s12 }
  0x29   :  { %v144_v9 = vld [vmem:[%s324_s2] ss:$0 sm:$0xff]  ;;  %s220_s13 = scalar_lea.vmem %s135_s12, 128  ;;  %p225_p3 = scmp.lt.s32.totalorder %s135_s12, %s135_s12 }
  0x2a   :  { %164 = vmatpush3.bf16.msra.mxu0 %v163_v5  ;;  %p221_p2 = scmp.ne.s32.totalorder %s135_s12, %s220_s13  ;;  %p226_p4 = scmp.lt.s32.totalorder %s220_s13, %s220_s13 }
  0x2b   :  { %165 = vmatprep.subr.bf16.mxu0 %v252_v0 }
  0x2c   :  { %p227_p5 = por %p226_p4, %p225_p3 }
  0x2e   :  { %167 = vmatpush3.bf16.msra.mxu0 %v166_v7  ;;  %p228_p6 = pnand %p227_p5, %p221_p2 }
  0x31   :  { %160 = vmatmul.mubr.msk.f32.vlgmr.msra.gmra.mrb[0].mxu0 %vm53_vm1, %v41_v8 }
 0x104   :  { %v123_v10 = vpop.f32.mrb[0].mxu0 }
 0x105   :  { %v124_v11 = vadd.f32 %v144_v9, %v123_v10  ;;  %v161_v12 = vpop.f32.mrb[1].mxu0 }
 0x107   :  { %127 = vst [vmem:[#allocation7] sm:$0xff] %v124_v11 }
 0x108   :  { %231 = shalt.err (!%p228_p6)
}
 0x109   :  { %s232_s16 = scalar_lea.hbm %s325_s3, 128 }
 0x10a   :  { %p233_p7 = scmp.ne.s32.totalorder %s325_s3, %s232_s16  ;;  %p236_p8 = scmp.lt.u32.totalorder %s232_s16, %s325_s3 }
 0x10c   :  { %p238_p9 = pnand %p236_p8, %p233_p7 }
 0x10e   :  { %241 = shalt.err (!%p238_p9)
}
 0x10f   :  { %137 = dma.vmem_to_hbm [thread:$0]  %s135_s12, 128, %s325_s3, [#allocation4]  }
 0x110   :  { %246 = dma.done.wait [#allocation4], 128  }
 0x111   :  { %247 = vsyncadd [#allocation4], 4294967168 }
 0x112   :  { %141 = vsyncpa [#allocation3], 1 }
 0x113   :  { %142 = vsyncpa [#allocation6], 1 }
 0x114   :  { %143 = vsyncpa [#allocation4], 1 }

</bundles_post_ra>
